<compile_context>
chip_gen: v5e
topology: v5e:2x2
jax: 0.10.0
libtpu: 0.0.40
codegen_flags: <defaults>
</compile_context>

<pallas_src>
import functools

import jax
import jax.numpy as jnp
from jax import lax
from jax.experimental import pallas as pl
from jax.experimental.pallas import tpu as pltpu


def _mha_head_kernel(x_ref, wq_ref, wk_ref, wv_ref, bq_ref, bk_ref, bv_ref,
                     wp_ref, bp_ref, o_ref, acc_ref,
                     *, scale: float, n_valid: int, n_pad: int):
    """One (batch, head) grid step: per-head qkv proj, attention, accumulate
    the head's contribution to the output projection."""
    h = pl.program_id(1)

    x = x_ref[0]                                    # (N, C) bf16

    # Per-head projections, lane-dense (N, d). MXU matmuls in bf16, f32 acc.
    q = jnp.dot(x, wq_ref[0], preferred_element_type=jnp.float32) + bq_ref[0]
    k = jnp.dot(x, wk_ref[0], preferred_element_type=jnp.float32) + bk_ref[0]
    v = jnp.dot(x, wv_ref[0], preferred_element_type=jnp.float32) + bv_ref[0]

    # Fold softmax scale into q (scales (N, d) instead of (N, N)).
    q = (q * scale).astype(jnp.bfloat16)
    k = k.astype(jnp.bfloat16)
    v = v.astype(jnp.bfloat16)

    # QK^T as a contraction over the last dims — no explicit transpose.
    s = lax.dot_general(q, k, (((1,), (1,)), ((), ())),
                        preferred_element_type=jnp.float32)      # (N, N) f32

    # Mask out padded key columns (static branch; only emitted when padding).
    if n_valid < n_pad:
        col = lax.broadcasted_iota(jnp.int32, (n_pad, n_pad), 1)
        s = jnp.where(col < n_valid, s, -jnp.inf)

    # Numerically-stable softmax, kept in f32 (v5e has no bf16 VPU/EUP).
    s = s - jnp.max(s, axis=-1, keepdims=True)
    p = jnp.exp(s)
    p = p * pl.reciprocal(jnp.sum(p, axis=-1, keepdims=True), approx=True)

    o_h = jnp.dot(p.astype(jnp.bfloat16), v,
                  preferred_element_type=jnp.float32)            # (N, d)

    # Out-projection folded into the head loop: acc += o_h @ Wp[h*d:(h+1)*d,:]
    contrib = jnp.dot(o_h.astype(jnp.bfloat16), wp_ref[0],
                      preferred_element_type=jnp.float32)        # (N, C)

    @pl.when(h == 0)
    def _():
        acc_ref[...] = jnp.zeros_like(acc_ref)

    acc_ref[...] += contrib

    @pl.when(h == pl.num_programs(1) - 1)
    def _():
        o_ref[0] = (acc_ref[...] + bp_ref[...]).astype(o_ref.dtype)


def multi_head_attention(x, w_qkv, b_qkv, w_proj, b_proj, *, num_heads,
                         compute_dtype=jnp.bfloat16):
    """x: (B, N, C); w_qkv: (C, 3C) (in, out); b_qkv: (3C,);
    w_proj: (C, C) (in, out); b_proj: (C,). Matches nn.Linear with W^T."""
    B, N, C = x.shape
    H = num_heads
    assert C % H == 0
    d = C // H
    out_dtype = x.dtype

    # Pad tokens to a sublane-friendly multiple (16 for bf16 activations).
    pad_to = 16
    n_pad = ((N + pad_to - 1) // pad_to) * pad_to
    x_p = x if n_pad == N else jnp.pad(x, ((0, 0), (0, n_pad - N), (0, 0)))
    x_p = x_p.astype(compute_dtype)

    # Split fused qkv weights into lane-dense per-head tiles.
    wq, wk, wv = jnp.split(w_qkv, 3, axis=1)                 # each (C, C)

    def per_head_w(w):                                       # (C, C) -> (H, C, d)
        return w.reshape(C, H, d).transpose(1, 0, 2).astype(compute_dtype)

    wq_h, wk_h, wv_h = per_head_w(wq), per_head_w(wk), per_head_w(wv)

    bq, bk, bv = jnp.split(b_qkv.reshape(-1), 3)             # each (C,)

    def per_head_b(b):                                       # (C,) -> (H, 1, d) f32
        return b.reshape(H, 1, d).astype(jnp.float32)

    bq_h, bk_h, bv_h = per_head_b(bq), per_head_b(bk), per_head_b(bv)

    wp_h = w_proj.reshape(H, d, C).astype(compute_dtype)     # rows grouped by head
    bp = b_proj.reshape(1, C).astype(jnp.float32)

    kernel = functools.partial(_mha_head_kernel, scale=d ** (-0.5),
                               n_valid=N, n_pad=n_pad)

    out = pl.pallas_call(
        kernel,
        out_shape=jax.ShapeDtypeStruct((B, n_pad, C), out_dtype),
        grid_spec=pltpu.PrefetchScalarGridSpec(
            num_scalar_prefetch=0,
            grid=(B, H),                                     # heads innermost (reduction)
            in_specs=[
                pl.BlockSpec((1, n_pad, C), lambda b, h: (b, 0, 0)),   # x
                pl.BlockSpec((1, C, d), lambda b, h: (h, 0, 0)),       # Wq_h
                pl.BlockSpec((1, C, d), lambda b, h: (h, 0, 0)),       # Wk_h
                pl.BlockSpec((1, C, d), lambda b, h: (h, 0, 0)),       # Wv_h
                pl.BlockSpec((1, 1, d), lambda b, h: (h, 0, 0)),       # bq_h
                pl.BlockSpec((1, 1, d), lambda b, h: (h, 0, 0)),       # bk_h
                pl.BlockSpec((1, 1, d), lambda b, h: (h, 0, 0)),       # bv_h
                pl.BlockSpec((1, d, C), lambda b, h: (h, 0, 0)),       # Wp_h
                pl.BlockSpec((1, C), lambda b, h: (0, 0)),             # b_proj
            ],
            out_specs=pl.BlockSpec((1, n_pad, C), lambda b, h: (b, 0, 0)),
            scratch_shapes=[pltpu.VMEM((n_pad, C), jnp.float32)],      # f32 accumulator
        ),
        compiler_params=pltpu.CompilerParams(
            dimension_semantics=("parallel", "arbitrary")),
    )(x_p, wq_h, wk_h, wv_h, bq_h, bk_h, bv_h, wp_h, bp)

    if n_pad != N:
        out = out[:, :N, :]
    return out
    # TODO(synk): for very long sequences add a flash-style query-tile grid axis;
    # at ViT token counts (N ~ 200) the full (N, N) attention tile fits VMEM easily.


def _reference(x, w_qkv, b_qkv, w_proj, b_proj, num_heads):
    """Pure-JAX f32 reference mirroring the PyTorch forward."""
    B, N, C = x.shape
    d = C // num_heads
    qkv = x @ w_qkv + b_qkv                                  # (B, N, 3C)
    q, k, v = jnp.split(qkv, 3, axis=-1)

    def to_heads(t):  # b n (h d) -> b h n d
        return t.reshape(B, N, num_heads, d).transpose(0, 2, 1, 3)

    q, k, v = map(to_heads, (q, k, v))
    attn = jnp.einsum("bhnd,bhmd->bhnm", q, k) * (d ** -0.5)
    attn = jax.nn.softmax(attn, axis=-1)
    o = jnp.einsum("bhnm,bhmd->bhnd", attn, v)
    o = o.transpose(0, 2, 1, 3).reshape(B, N, C)             # b h n d -> b n (h d)
    return o @ w_proj + b_proj


if __name__ == "__main__":
    B, N, C = 2, 8, 32
    num_heads = 4

    key = jax.random.PRNGKey(0)
    kx, kw1, kb1, kw2, kb2 = jax.random.split(key, 5)

    x = jax.random.normal(kx, (B, N, C), dtype=jnp.float32)
    # Linear params stored as (in, out); equivalent to nn.Linear's x @ W.T + b.
    w_qkv = jax.random.normal(kw1, (C, 3 * C), dtype=jnp.float32) * 0.02
    b_qkv = jax.random.normal(kb1, (3 * C,), dtype=jnp.float32) * 0.02
    w_proj = jax.random.normal(kw2, (C, C), dtype=jnp.float32) * 0.02
    b_proj = jax.random.normal(kb2, (C,), dtype=jnp.float32) * 0.02

    out = multi_head_attention(x, w_qkv, b_qkv, w_proj, b_proj,
                               num_heads=num_heads)
    out = jax.block_until_ready(out)

    ref = _reference(x, w_qkv, b_qkv, w_proj, b_proj, num_heads)
    assert out.shape == (B, N, C)
    max_err = float(jnp.max(jnp.abs(out.astype(jnp.float32) - ref)))
    # bf16 matmuls vs f32 reference -> loosened tolerance.
    assert max_err < 2e-2, f"mismatch vs reference: max abs err {max_err}"

    print("KERNEL_OK")
</pallas_src>

<mosaic_0001>
module attributes {stable_mosaic.version = 11 : i64} {
  func.func @_mha_head_kernel(%arg0: i32, %arg1: i32, %arg2: memref<1x16x32xbf16, #tpu.memory_space<vmem>>, %arg3: memref<1x32x8xbf16, #tpu.memory_space<vmem>>, %arg4: memref<1x32x8xbf16, #tpu.memory_space<vmem>>, %arg5: memref<1x32x8xbf16, #tpu.memory_space<vmem>>, %arg6: memref<1x1x8xf32, #tpu.memory_space<vmem>>, %arg7: memref<1x1x8xf32, #tpu.memory_space<vmem>>, %arg8: memref<1x1x8xf32, #tpu.memory_space<vmem>>, %arg9: memref<1x8x32xbf16, #tpu.memory_space<vmem>>, %arg10: memref<1x32xf32, #tpu.memory_space<vmem>>, %arg11: memref<1x16x32xf32, #tpu.memory_space<vmem>>, %arg12: memref<16x32xf32, #tpu.memory_space<vmem>>) attributes {dimension_semantics = [#tpu.dimension_semantics<parallel>, #tpu.dimension_semantics<arbitrary>], iteration_bounds = array<i64: 2, 4>, scalar_prefetch = 0 : i64, scratch_operands = 1 : i64, tpu.core_type = #tpu.core_type<tc>, window_params = [{transform_indices = @transform_0, window_bounds = array<i64: 1, 16, 32>}, {transform_indices = @transform_1, window_bounds = array<i64: 1, 32, 8>}, {transform_indices = @transform_2, window_bounds = array<i64: 1, 32, 8>}, {transform_indices = @transform_3, window_bounds = array<i64: 1, 32, 8>}, {transform_indices = @transform_4, window_bounds = array<i64: 1, 1, 8>}, {transform_indices = @transform_5, window_bounds = array<i64: 1, 1, 8>}, {transform_indices = @transform_6, window_bounds = array<i64: 1, 1, 8>}, {transform_indices = @transform_7, window_bounds = array<i64: 1, 8, 32>}, {pipeline_mode = #tpu.pipeline_mode<synchronous>, transform_indices = @transform_8, window_bounds = array<i64: 1, 32>}, {transform_indices = @transform_9, window_bounds = array<i64: 1, 16, 32>}]} {
    %c0 = arith.constant 0 : index
    %c0_0 = arith.constant 0 : index
    %c0_1 = arith.constant 0 : index
    %0 = vector.load %arg2[%c0, %c0_0, %c0_1] : memref<1x16x32xbf16, #tpu.memory_space<vmem>>, vector<1x16x32xbf16>
    %1 = vector.shape_cast %0 : vector<1x16x32xbf16> to vector<16x32xbf16>
    %c0_2 = arith.constant 0 : index
    %c0_3 = arith.constant 0 : index
    %c0_4 = arith.constant 0 : index
    %2 = vector.load %arg3[%c0_2, %c0_3, %c0_4] : memref<1x32x8xbf16, #tpu.memory_space<vmem>>, vector<1x32x8xbf16>
    %3 = vector.shape_cast %2 : vector<1x32x8xbf16> to vector<32x8xbf16>
    %cst = arith.constant dense<0.000000e+00> : vector<16x8xf32>
    %4 = tpu.matmul %1, %3, %cst {dimension_numbers = #tpu.dot_dimension_numbers<[1], [0], [0], [1], [0, 0, 1, 1], [], []>} : vector<16x32xbf16>, vector<32x8xbf16>, vector<16x8xf32> -> vector<16x8xf32>
    %c0_5 = arith.constant 0 : index
    %c0_6 = arith.constant 0 : index
    %c0_7 = arith.constant 0 : index
    %5 = vector.load %arg6[%c0_5, %c0_6, %c0_7] : memref<1x1x8xf32, #tpu.memory_space<vmem>>, vector<1x1x8xf32>
    %6 = vector.shape_cast %5 : vector<1x1x8xf32> to vector<1x8xf32>
    %7 = vector.broadcast %6 : vector<1x8xf32> to vector<16x8xf32>
    %8 = arith.addf %4, %7 : vector<16x8xf32>
    %c0_8 = arith.constant 0 : index
    %c0_9 = arith.constant 0 : index
    %c0_10 = arith.constant 0 : index
    %9 = vector.load %arg4[%c0_8, %c0_9, %c0_10] : memref<1x32x8xbf16, #tpu.memory_space<vmem>>, vector<1x32x8xbf16>
    %10 = vector.shape_cast %9 : vector<1x32x8xbf16> to vector<32x8xbf16>
    %cst_11 = arith.constant dense<0.000000e+00> : vector<16x8xf32>
    %11 = tpu.matmul %1, %10, %cst_11 {dimension_numbers = #tpu.dot_dimension_numbers<[1], [0], [0], [1], [0, 0, 1, 1], [], []>} : vector<16x32xbf16>, vector<32x8xbf16>, vector<16x8xf32> -> vector<16x8xf32>
    %c0_12 = arith.constant 0 : index
    %c0_13 = arith.constant 0 : index
    %c0_14 = arith.constant 0 : index
    %12 = vector.load %arg7[%c0_12, %c0_13, %c0_14] : memref<1x1x8xf32, #tpu.memory_space<vmem>>, vector<1x1x8xf32>
    %13 = vector.shape_cast %12 : vector<1x1x8xf32> to vector<1x8xf32>
    %14 = vector.broadcast %13 : vector<1x8xf32> to vector<16x8xf32>
    %15 = arith.addf %11, %14 : vector<16x8xf32>
    %c0_15 = arith.constant 0 : index
    %c0_16 = arith.constant 0 : index
    %c0_17 = arith.constant 0 : index
    %16 = vector.load %arg5[%c0_15, %c0_16, %c0_17] : memref<1x32x8xbf16, #tpu.memory_space<vmem>>, vector<1x32x8xbf16>
    %17 = vector.shape_cast %16 : vector<1x32x8xbf16> to vector<32x8xbf16>
    %cst_18 = arith.constant dense<0.000000e+00> : vector<16x8xf32>
    %18 = tpu.matmul %1, %17, %cst_18 {dimension_numbers = #tpu.dot_dimension_numbers<[1], [0], [0], [1], [0, 0, 1, 1], [], []>} : vector<16x32xbf16>, vector<32x8xbf16>, vector<16x8xf32> -> vector<16x8xf32>
    %c0_19 = arith.constant 0 : index
    %c0_20 = arith.constant 0 : index
    %c0_21 = arith.constant 0 : index
    %19 = vector.load %arg8[%c0_19, %c0_20, %c0_21] : memref<1x1x8xf32, #tpu.memory_space<vmem>>, vector<1x1x8xf32>
    %20 = vector.shape_cast %19 : vector<1x1x8xf32> to vector<1x8xf32>
    %21 = vector.broadcast %20 : vector<1x8xf32> to vector<16x8xf32>
    %22 = arith.addf %18, %21 : vector<16x8xf32>
    %cst_22 = arith.constant 0.353553385 : f32
    %23 = vector.broadcast %cst_22 : f32 to vector<16x8xf32>
    %24 = arith.mulf %8, %23 : vector<16x8xf32>
    %25 = arith.truncf %24 : vector<16x8xf32> to vector<16x8xbf16>
    %26 = arith.truncf %15 : vector<16x8xf32> to vector<16x8xbf16>
    %27 = arith.truncf %22 : vector<16x8xf32> to vector<16x8xbf16>
    %cst_23 = arith.constant dense<0.000000e+00> : vector<16x16xf32>
    %28 = tpu.matmul %25, %26, %cst_23 {dimension_numbers = #tpu.dot_dimension_numbers<[1], [1], [0], [0], [0, 0, 1, 0], [], []>} : vector<16x8xbf16>, vector<16x8xbf16>, vector<16x16xf32> -> vector<16x16xf32>
    %29 = tpu.iota {dimensions = array<i32: 1>} : vector<16x16xi32>
    %c8_i32 = arith.constant 8 : i32
    %30 = vector.broadcast %c8_i32 : i32 to vector<16x16xi32>
    %31 = arith.cmpi slt, %29, %30 : vector<16x16xi32>
    %cst_24 = arith.constant 0xFF800000 : f32
    %32 = vector.broadcast %cst_24 : f32 to vector<16x16xf32>
    %33 = arith.select %31, %28, %32 : vector<16x16xi1>, vector<16x16xf32>
    %cst_25 = arith.constant dense<0xFF800000> : vector<16xf32>
    %34 = vector.multi_reduction <maximumf>, %33, %cst_25 [1] : vector<16x16xf32> to vector<16xf32>
    %35 = vector.shape_cast %34 : vector<16xf32> to vector<16x1xf32>
    %36 = vector.broadcast %35 : vector<16x1xf32> to vector<16x16xf32>
    %37 = arith.subf %33, %36 : vector<16x16xf32>
    %38 = math.exp %37 : vector<16x16xf32>
    %cst_26 = arith.constant dense<0.000000e+00> : vector<16xf32>
    %39 = vector.multi_reduction <add>, %38, %cst_26 [1] : vector<16x16xf32> to vector<16xf32>
    %40 = vector.shape_cast %39 : vector<16xf32> to vector<16x1xf32>
    %41 = tpu.reciprocal %40 {approx = true} : vector<16x1xf32> -> vector<16x1xf32>
    %42 = vector.broadcast %41 : vector<16x1xf32> to vector<16x16xf32>
    %43 = arith.mulf %38, %42 : vector<16x16xf32>
    %44 = arith.truncf %43 : vector<16x16xf32> to vector<16x16xbf16>
    %cst_27 = arith.constant dense<0.000000e+00> : vector<16x8xf32>
    %45 = tpu.matmul %44, %27, %cst_27 {dimension_numbers = #tpu.dot_dimension_numbers<[1], [0], [0], [1], [0, 0, 1, 1], [], []>} : vector<16x16xbf16>, vector<16x8xbf16>, vector<16x8xf32> -> vector<16x8xf32>
    %46 = arith.truncf %45 : vector<16x8xf32> to vector<16x8xbf16>
    %c0_28 = arith.constant 0 : index
    %c0_29 = arith.constant 0 : index
    %c0_30 = arith.constant 0 : index
    %47 = vector.load %arg9[%c0_28, %c0_29, %c0_30] : memref<1x8x32xbf16, #tpu.memory_space<vmem>>, vector<1x8x32xbf16>
    %48 = vector.shape_cast %47 : vector<1x8x32xbf16> to vector<8x32xbf16>
    %cst_31 = arith.constant dense<0.000000e+00> : vector<16x32xf32>
    %49 = tpu.matmul %46, %48, %cst_31 {dimension_numbers = #tpu.dot_dimension_numbers<[1], [0], [0], [1], [0, 0, 1, 1], [], []>} : vector<16x8xbf16>, vector<8x32xbf16>, vector<16x32xf32> -> vector<16x32xf32>
    %c0_i32 = arith.constant 0 : i32
    %50 = arith.cmpi eq, %arg1, %c0_i32 : i32
    %51 = arith.extui %50 : i1 to i32
    %c0_i32_32 = arith.constant 0 : i32
    %52 = arith.cmpi ne, %51, %c0_i32_32 : i32
    scf.if %52 {
      %cst_38 = arith.constant 0.000000e+00 : f32
      %59 = vector.broadcast %cst_38 : f32 to vector<16x32xf32>
      %c0_39 = arith.constant 0 : index
      %c0_40 = arith.constant 0 : index
      %60 = vector.load %arg12[%c0_39, %c0_40] : memref<16x32xf32, #tpu.memory_space<vmem>>, vector<16x32xf32>
      tpu.vector_store %arg12[%c0_39, %c0_40], %59 {strides = array<i32>} : memref<16x32xf32, #tpu.memory_space<vmem>>, vector<16x32xf32>,
    } else {
    }
    %c0_33 = arith.constant 0 : index
    %c0_34 = arith.constant 0 : index
    %53 = vector.load %arg12[%c0_33, %c0_34] : memref<16x32xf32, #tpu.memory_space<vmem>>, vector<16x32xf32>
    %54 = arith.addf %53, %49 : vector<16x32xf32>
    %c0_35 = arith.constant 0 : index
    %c0_36 = arith.constant 0 : index
    %55 = vector.load %arg12[%c0_35, %c0_36] : memref<16x32xf32, #tpu.memory_space<vmem>>, vector<16x32xf32>
    tpu.vector_store %arg12[%c0_35, %c0_36], %54 {strides = array<i32>} : memref<16x32xf32, #tpu.memory_space<vmem>>, vector<16x32xf32>,
    %c3_i32 = arith.constant 3 : i32
    %56 = arith.cmpi eq, %arg1, %c3_i32 : i32
    %57 = arith.extui %56 : i1 to i32
    %c0_i32_37 = arith.constant 0 : i32
    %58 = arith.cmpi ne, %57, %c0_i32_37 : i32
    scf.if %58 {
      %c0_38 = arith.constant 0 : index
      %c0_39 = arith.constant 0 : index
      %59 = vector.load %arg12[%c0_38, %c0_39] : memref<16x32xf32, #tpu.memory_space<vmem>>, vector<16x32xf32>
      %c0_40 = arith.constant 0 : index
      %c0_41 = arith.constant 0 : index
      %60 = vector.load %arg10[%c0_40, %c0_41] : memref<1x32xf32, #tpu.memory_space<vmem>>, vector<1x32xf32>
      %61 = vector.broadcast %60 : vector<1x32xf32> to vector<16x32xf32>
      %62 = arith.addf %59, %61 : vector<16x32xf32>
      %c0_42 = arith.constant 0 : index
      %c0_43 = arith.constant 0 : index
      %c0_44 = arith.constant 0 : index
      %63 = vector.load %arg11[%c0_42, %c0_43, %c0_44] : memref<1x16x32xf32, #tpu.memory_space<vmem>>, vector<1x16x32xf32>
      %64 = vector.shape_cast %63 : vector<1x16x32xf32> to vector<16x32xf32>
      %65 = vector.shape_cast %62 : vector<16x32xf32> to vector<1x16x32xf32>
      tpu.vector_store %arg11[%c0_42, %c0_43, %c0_44], %65 {strides = array<i32>} : memref<1x16x32xf32, #tpu.memory_space<vmem>>, vector<1x16x32xf32>,
    } else {
    }
    return
  }
  func.func @transform_0(%arg0: i32, %arg1: i32) -> (i32, i32, i32) {
    %c0_i32 = arith.constant 0 : i32
    %c0_i32_0 = arith.constant 0 : i32
    %c0_i32_1 = arith.constant 0 : i32
    return %arg0, %c0_i32, %c0_i32_0 : i32, i32, i32
  }
  func.func @transform_1(%arg0: i32, %arg1: i32) -> (i32, i32, i32) {
    %c0_i32 = arith.constant 0 : i32
    %c0_i32_0 = arith.constant 0 : i32
    %c0_i32_1 = arith.constant 0 : i32
    return %arg1, %c0_i32, %c0_i32_0 : i32, i32, i32
  }
  func.func @transform_2(%arg0: i32, %arg1: i32) -> (i32, i32, i32) {
    %c0_i32 = arith.constant 0 : i32
    %c0_i32_0 = arith.constant 0 : i32
    %c0_i32_1 = arith.constant 0 : i32
    return %arg1, %c0_i32, %c0_i32_0 : i32, i32, i32
  }
  func.func @transform_3(%arg0: i32, %arg1: i32) -> (i32, i32, i32) {
    %c0_i32 = arith.constant 0 : i32
    %c0_i32_0 = arith.constant 0 : i32
    %c0_i32_1 = arith.constant 0 : i32
    return %arg1, %c0_i32, %c0_i32_0 : i32, i32, i32
  }
  func.func @transform_4(%arg0: i32, %arg1: i32) -> (i32, i32, i32) {
    %c0_i32 = arith.constant 0 : i32
    %c0_i32_0 = arith.constant 0 : i32
    %c0_i32_1 = arith.constant 0 : i32
    return %arg1, %c0_i32, %c0_i32_0 : i32, i32, i32
  }
  func.func @transform_5(%arg0: i32, %arg1: i32) -> (i32, i32, i32) {
    %c0_i32 = arith.constant 0 : i32
    %c0_i32_0 = arith.constant 0 : i32
    %c0_i32_1 = arith.constant 0 : i32
    return %arg1, %c0_i32, %c0_i32_0 : i32, i32, i32
  }
  func.func @transform_6(%arg0: i32, %arg1: i32) -> (i32, i32, i32) {
    %c0_i32 = arith.constant 0 : i32
    %c0_i32_0 = arith.constant 0 : i32
    %c0_i32_1 = arith.constant 0 : i32
    return %arg1, %c0_i32, %c0_i32_0 : i32, i32, i32
  }
  func.func @transform_7(%arg0: i32, %arg1: i32) -> (i32, i32, i32) {
    %c0_i32 = arith.constant 0 : i32
    %c0_i32_0 = arith.constant 0 : i32
    %c0_i32_1 = arith.constant 0 : i32
    return %arg1, %c0_i32, %c0_i32_0 : i32, i32, i32
  }
  func.func @transform_8(%arg0: i32, %arg1: i32) -> (i32, i32) {
    %c0_i32 = arith.constant 0 : i32
    %c0_i32_0 = arith.constant 0 : i32
    %c0_i32_1 = arith.constant 0 : i32
    return %c0_i32, %c0_i32_0 : i32, i32
  }
  func.func @transform_9(%arg0: i32, %arg1: i32) -> (i32, i32, i32) {
    %c0_i32 = arith.constant 0 : i32
    %c0_i32_0 = arith.constant 0 : i32
    %c0_i32_1 = arith.constant 0 : i32
    return %arg0, %c0_i32, %c0_i32_0 : i32, i32, i32
  }
}

</mosaic_0001>

<bundles_post_ra>
// kernel: tpu_custom_call.1
= control target key start
LH: loop header
LB: loop body
LE: loop exit
PB: predicated region body
PF: predicated region fallthrough
CT: control target
= control target key end

     0   :  { %s1345_s0 = inlined_call_operand.vmem [shape: bf16[2,16,32], index: 0, kind: input, shape index: {}]   ;;  %s1346_s1 = inlined_call_operand.vmem [shape: bf16[4,32,8], index: 1, kind: input, shape index: {}]   ;;  %s1347_s2 = inlined_call_operand.vmem [shape: bf16[4,32,8], index: 2, kind: input, shape index: {}]   ;;  %s1348_s3 = inlined_call_operand.vmem [shape: bf16[4,32,8], index: 3, kind: input, shape index: {}]   ;;  %s1349_s4 = inlined_call_operand.vmem [shape: f32[4,1,8], index: 4, kind: input, shape index: {}]   ;;  %s1350_s5 = inlined_call_operand.vmem [shape: f32[4,1,8], index: 5, kind: input, shape index: {}]   ;;  %s1351_s6 = inlined_call_operand.vmem [shape: f32[4,1,8], index: 6, kind: input, shape index: {}]   ;;  %s1352_s7 = inlined_call_operand.vmem [shape: bf16[4,8,32], index: 7, kind: input, shape index: {}]   ;;  %s1353_s8 = inlined_call_operand.vmem [shape: f32[1,32], index: 8, kind: input, shape index: {}]   ;;  %s1354_s9 = inlined_call_operand.hbm [shape: f32[2,16,32], index: 9, kind: output, shape index: {}]  }
   0x1   :  { %1362 = sst [smem:[#allocation14_spill]] %s1349_s4 }
   0x2   :  { %14 = vsyncpa [#allocation4], 0 }
   0x3   :  { %16 = vsyncpa [#allocation4 + $0x1], 0  ;;  %s1164_s30 = smov 0   ;;  %s1166_s10 = smov 0  }
   0x4   :  { %s1168_s11 = smov 0   ;;  %s1170_s12 = smov 0  }
   0x5   :  { %s1172_s13 = smov 0   ;;  %s1174_s14 = smov 0  }
   0x6   :  { %s1176_s15 = smov 0   ;;  %s1178_s16 = smov 0  }
   0x7 LB: > { %1363 = sst [smem:[#allocation6_spill]] %s1081_s30  ;;  %s861_s17 = sadd.s32 4294967295, %s1109_s16   ;;  %s1109_s16 = sphi %s1178_s16, %s22_s16   ;;  %s1105_s15 = sphi %s1176_s15, %s1382_s15   ;;  %s1101_s14 = sphi %s1174_s14, %s1381_s14   ;;  %s1097_s13 = sphi %s1172_s13, %s1380_s13   ;;  %s1093_s12 = sphi %s1170_s12, %s1385_s12   ;;  %s1089_s11 = sphi %s1168_s11, %s1378_s11   ;;  %s1085_s10 = sphi %s1166_s10, %s1384_s10   ;;  %s1081_s30 = sphi %s1164_s30, %s1383_s30  }
   0x8   : > { %1364 = sst [smem:[#allocation7_spill]] %s1089_s11  ;;  %s862_s18 = sadd.s32 4294967294, %s1109_s16  }
   0x9   : > { %1365 = sst [smem:[#allocation8_spill]] %s1101_s14  ;;  %s31_s19 = sadd.s32 1, %s1101_s14 }
   0xa   : > { %1366 = sst [smem:[#allocation9_spill]] %s1105_s15  ;;  %p32_p0 = scmp.ge.s32.totalorder %s31_s19, 4 }
   0xb   : > { %s34_s20 = sadd.s32 1, %s1105_s15  ;;  %p280_p1 = scmp.ne.s32.totalorder %s1089_s11, %s1085_s10 }
   0xc   : > { %p281_p2 = scmp.eq.s32.totalorder %s861_s17, 7  ;;  %s1387_s19 = smov (%p32_p0, %s31_s19), 0 }
   0xd   : > { %1367 = sst [smem:[#allocation10_spill]] %s1387_s19  ;;  %s1389_s20 = smov (!%p32_p0, %s34_s20), %s1105_s15 }
   0xe   : > { %p1213_p3 = por %p281_p2, %p280_p1  ;;  %p286_p4 = scmp.ne.s32.totalorder %s1085_s10, %s1081_s30 }
   0xf   : > { %p36_p5 = scmp.ge.s32.totalorder %s1389_s20, 2  ;;  %p287_p6 = scmp.eq.s32.totalorder %s862_s18, 7 }
  0x10   : > { %p865_p7 = scmp.ge.s32.totalorder %s1109_s16, 1  ;;  %p365_p8 = scmp.lt.s32.totalorder %s1109_s16, 9 }
  0x11   : > { %s1391_s20 = smov (%p36_p5, %s1389_s20), 0  ;;  %p1223_p9 = por %p287_p6, %p286_p4 }
  0x12   : > { %1369 = sst [smem:[#allocation11_spill]] %s1391_s20  ;;  %p366_p10 = pnand %p865_p7, %p365_p8 }
  0x13   : > { %s1370_s22 = scalar_select %p1223_p9, 1, 0 }
  0x14   : > { %s267_s23 = ssub.s32 %s1105_s15, %s1391_s20  ;;  %s270_s24 = sadd.s32 1, %s1089_s11 }
  0x15   : > { %1371 = sst [smem:[#allocation12_spill]] %s1370_s22  ;;  %p268_p11 = scmp.eq.s32.totalorder %s267_s23, 0 }
  0x16   : > { %369 = sbr.rel (%p366_p10) target bundleno = 892 (0x37c), region = 56  ;;  %s1356_s26 = sand.u32 (!%p366_p10), 1, %s1085_s10  }
  0x17   : > { %s1231_s25 = scalar_select %p268_p11, %s1089_s11, %s270_s24  }
  0x18   : > { %p434_p12 = scmp.lt.s32.totalorder (!%p366_p10), %s1093_s12, 3  ;;  %s1237_s27 = sshll.u32 (!%p366_p10), %s1356_s26, 4 }
  0x19   : > { %1372 = sst [smem:[#allocation13_spill]] %s1231_s25  ;;  %p429_p13 = scmp.lt.s32.totalorder (!%p366_p10), %s1097_s13, 1 }
  0x1a   : > { %s1373_s4 = sld [smem:[#allocation14_spill]] (!%p366_p10)  ;;  %p910_p0 = scmp.ne.s32.totalorder (!%p366_p10), %s1093_s12, 0 }
  0x1b   : > { %s1241_s28 = scalar_select %p434_p12, %s1093_s12, 3  ;;  %vm490_vm0 = vcmask 261120   ;;  %vm581_vm1 = vcmask 64512   ;;  %v602_v22 = vlaneseq  ;;  %vm607_vm3 = vcmask 130048  }
  0x1c   : > { %s430_s29 = scalar_select %p429_p13, %s1097_s13, 1  ;;  %vm653_vm4 = vcmask 1043456  }
  0x1d   : > { %s1245_s17 = sshll.u32 %s1241_s28, 4  ;;  %s454_s19 = scalar_lea.vmem %s1350_s5, %s1241_s28  ;;  %v603_v23 = vand.u32 127, %v602_v22 }
  0x1e   : > { %s438_s26 = scalar_lea.vmem %s1346_s1, %s1245_s17  ;;  %s443_s25 = scalar_lea.vmem %s1347_s2, %s1245_s17  ;;  %v1004_v7 = vld [vmem:[%s454_s19] ss:$0 sm:$0xff] }
  0x1f   : > { %v923_v0 = vld [vmem:[%s438_s26 + $0x8] sm:$0xff]  ;;  %s917_s11 = sshll.u32 %s430_s29, 3  ;;  %v922_v2 = vld [vmem:[%s438_s26] sm:$0xff]  ;;  %vm604_vm2 = vcmp.lt.s32.totalorder %v603_v23, 8  ;;  %s457_s20 = scalar_lea.vmem %s1351_s6, %s1241_s28 }
  0x20   : > { %s451_s24 = scalar_lea.vmem %s1373_s4, %s1241_s28  ;;  %v925_v1 = vld [vmem:[%s443_s25 + $0x8] sm:$0xff]  ;;  %500 = vmatpush.bf16.msra.mxu0 %v923_v0  ;;  %v924_v3 = vld [vmem:[%s443_s25] sm:$0xff]  ;;  %s433_s23 = scalar_lea.vmem %s1345_s0, %s917_s11 }
  0x21   : > { %534 = vmatpush.bf16.msra.mxu1 %v925_v1  ;;  %v921_v4 = vld [vmem:[%s433_s23] sm:$0xff]  ;;  %s448_s11 = scalar_lea.vmem %s1348_s3, %s1245_s17  ;;  %s875_s22 = sshll.u32 %s1241_s28, 2 }
  0x22   : > { %v1003_v10 = vld [vmem:[%s451_s24] ss:$0 sm:$0xff]  ;;  %v927_v20 = vld [vmem:[%s448_s11 + $0x8] sm:$0xff]  ;;  %s461_s29 = scalar_lea.vmem %s1352_s7, %s875_s22  ;;  %s428_s28 = scalar_lea.vmem [#allocation3], %s1237_s27 }
  0x23   : > { %568 = vmatpush.bf16.msra.mxu2 %v927_v20  ;;  %v926_v21 = vld [vmem:[%s448_s11] sm:$0xff] }
  0x24   : > { %501 = vmatpush.bf16.msra.mxu0 %v922_v2  ;;  %v1005_v34 = vld [vmem:[%s457_s20] ss:$0 sm:$0xff] }
  0x25   : > { %535 = vmatpush.bf16.msra.mxu1 %v924_v3  ;;  %v649_v46 = vld [vmem:[%s461_s29] sm:$0xf] }
  0x26   : > { %v655_v47 = vsel %vm653_vm4, %v649_v46, 0 }
  0x27   : > { %888 = vmatmul.msk.bf16.vlgmr.msra.gmra.mxu0 %vm490_vm0, %v921_v4  ;;  %569 = vmatpush.bf16.msra.mxu2 %v926_v21 }
  0x28   : > { %897 = vmatmul.msk.bf16.vlgmr.msra.gmra.mxu1 %vm490_vm0, %v921_v4 }
  0x29   : > { %664 = vmatpush.bf16.msrb.mxu1 %v655_v47 }
  0x2a   : > { %906 = vmatmul.msk.bf16.vlgmr.msra.gmra.mxu2 %vm490_vm0, %v921_v4 }
  0xa4   : > { %v503_v5 = vpop.f32.mrf.mxu0 }
  0xa5   : > { %v537_v6 = vpop.f32.mrf.mxu1  ;;  %v504_v15 = vadd.f32 %v1003_v10, %v503_v5 }
  0xa6   : > { %v538_v11 = vadd.f32 %v1004_v7, %v537_v6 }
  0xa7   : > { %v576_v18 = vmul.f32 0.35355338, %v504_v15 }
  0xac   : > { %v505_v8 = vpop.f32.mrf.mxu0 }
  0xad   : > { %v539_v9 = vpop.f32.mrf.mxu1  ;;  %v506_v13 = vadd.f32 %v1003_v10, %v505_v8  ;;  %v571_v32 = vpop.f32.mrf.mxu2 }
  0xae   : > { %v540_v12 = vadd.f32 %v1004_v7, %v539_v9  ;;  %v572_v36 = vadd.f32 %v1005_v34, %v571_v32 }
  0xaf   : > { %v577_v17 = vmul.f32 0.35355338, %v506_v13 }
  0xb0   : > { %v579_v14 = vpack.c.bf16 %v540_v12, %v538_v11 }
  0xb1   : > { %v578_v19 = vpack.c.bf16 %v577_v17, %v576_v18 }
  0xb2   : > { %v586_v16 = vsel %vm581_vm1, %v579_v14, 0 }
  0xb3   : > { %595 = vmatpush.bf16.xpose.msra.mxu3 %v586_v16 }
  0xb5   : > { %v573_v38 = vpop.f32.mrf.mxu2 }
  0xb6   : > { %v574_v39 = vadd.f32 %v1005_v34, %v573_v38 }
  0xb8   : > { %v580_v43 = vpack.c.bf16 %v574_v39, %v572_v36 }
  0xba   : > { %907 = vmatmul.msk.bf16.vlgmr.msra.gmra.mxu3 %vm581_vm1, %v578_v19  ;;  %641 = vmatpush.bf16.msrb.mxu0 %v580_v43 }
 0x13d   : > { %v597_v24 = vpop.f32.mrf.mxu3 }
 0x13e   : > { %v605_v25 = vsel %vm604_vm2, %v597_v24, -inf }
 0x13f   : > { %v608_v26 = vsel %vm607_vm3, %v605_v25, -inf }
 0x140   : > { %609 = vmax.xlane.f32.xlu0 %v608_v26 }
 0x145   : > { %v599_v27 = vpop.f32.mrf.mxu3 }
 0x146   : > { %v606_v28 = vsel %vm604_vm2, %v599_v27, -inf }
 0x147   : > { %v611_v29 = vsel %vm607_vm3, %v606_v28, -inf }
 0x148   : > { %612 = vmax.xlane.f32.xlu0 %v611_v29 }
 0x1b3   : > { %v610_v30 = vpop.xlane.xlu0 %609 }
 0x1b4   : > { %v614_v31 = vsub.f32 %v605_v25, %v610_v30 }
 0x1b6   : > { %v616_v33 = vmul.f32 1.442695, %v614_v31 }
 0x1b8   : > { %1006 = vpow2.f32 %v616_v33 }
 0x1bb   : > { %v613_v35 = vpop.xlane.xlu0 %612 }
 0x1bc   : > { %v615_v37 = vsub.f32 %v606_v28, %v613_v35 }
 0x1be   : > { %v1007_v40 = vpop.eup %1006  ;;  %v618_v41 = vmul.f32 1.442695, %v615_v37 }
 0x1bf   : > { %v620_v42 = vsel %vm607_vm3, %v1007_v40, 0.0 }
 0x1c0   : > { %1008 = vpow2.f32 %v618_v41  ;;  %621 = vadd.xlane.f32.xlu1 %v620_v42 }
 0x1c6   : > { %v1009_v44 = vpop.eup %1008 }
 0x1c7   : > { %v623_v45 = vsel %vm607_vm3, %v1009_v44, 0.0 }
 0x1c8   : > { %624 = vadd.xlane.f32.xlu1 %v623_v45 }
 0x233   : > { %v622_v48 = vpop.xlane.xlu1 %621 }
 0x234   : > { %1010 = vrcp.f32 %v622_v48 }
 0x23a   : > { %v1011_v50 = vpop.eup %1010 }
 0x23b   : > { %v625_v49 = vpop.xlane.xlu1 %624  ;;  %v628_v52 = vmul.f32 %v1011_v50, %v1007_v40 }
 0x23c   : > { %1012 = vrcp.f32 %v625_v49 }
 0x242   : > { %v1013_v51 = vpop.eup %1012 }
 0x243   : > { %v629_v53 = vmul.f32 %v1013_v51, %v1009_v44 }
 0x245   : > { %v630_v54 = vpack.c.bf16 %v629_v53, %v628_v52 }
 0x247   : > { %908 = vmatmul.msk.bf16.vlgmr.msrb.gmra.mxu0 %vm607_vm3, %v630_v54 }
 0x2c4   : > { %v643_v55 = vpop.f32.mrf.mxu0 }
 0x2cc   : > { %v645_v56 = vpop.f32.mrf.mxu0 }
 0x2cd   : > { %v648_v57 = vpack.c.bf16 %v645_v56, %v643_v55 }
 0x2cf   : > { %909 = vmatmul.msk.bf16.vlgmr.msrb.gmra.mxu1 %vm581_vm1, %v648_v57 }
 0x34c   : > { %v666_v58 = vpop.f32.mrf.mxu1 }
 0x350   : > { %674 = sbr.rel (%p910_p0) target bundleno = 856 (0x358), region = 60 }
 0x354   : > { %v668_v59 = vpop.f32.mrf.mxu1 }
 0x355   : > { %v1111_v60 = vmov 0.0  }
 0x356   : > { %675 = vst.msk [vmem:[#allocation2] sm:$0xff] %vm490_vm0, %v1111_v60 }
 0x357   : > { %676 = vst.msk [vmem:[#allocation2 + $0x8] sm:$0xff] %vm490_vm0, %v1111_v60 }
 0x358 PF: > { %p911_p1 = scmp.ne.s32.totalorder %s1093_s12, 3 }
 0x35d   : > { %v677_v61 = vld [vmem:[#allocation2] sm:$0xff]  ;;  %686 = sbr.rel (%p911_p1) target bundleno = 876 (0x36c), region = 64 }
 0x35e   : > { %v678_v62 = vld [vmem:[#allocation2 + $0x8] sm:$0xff]  ;;  %v679_v63 = vadd.f32 %v677_v61, %v666_v58 }
 0x35f   : > { %v680_v0 = vadd.f32 %v678_v62, %v668_v59 }
 0x360   : > { %681 = vst.msk [vmem:[#allocation2] sm:$0xff] %vm490_vm0, %v679_v63 }
 0x361   : > { %682 = vst.msk [vmem:[#allocation2 + $0x8] sm:$0xff] %vm490_vm0, %v680_v0 }
 0x362   : > { %v1014_v2 = vld [vmem:[%s1353_s8] ss:$0 sm:$0xff] }
 0x367   : > { %v687_v1 = vld [vmem:[#allocation2] sm:$0xff] }
 0x368   : > { %v688_v3 = vld [vmem:[#allocation2 + $0x8] sm:$0xff]  ;;  %v693_v4 = vadd.f32 %v1014_v2, %v687_v1 }
 0x369   : > { %v694_v5 = vadd.f32 %v1014_v2, %v688_v3 }
 0x36a   : > { %695 = vst.msk [vmem:[%s428_s28] sm:$0xff] %vm490_vm0, %v693_v4 }
 0x36b   : > { %696 = vst.msk [vmem:[%s428_s28 + $0x8] sm:$0xff] %vm490_vm0, %v694_v5 }
 0x36c PF: > { %s928_s24 = sshll.u32 %s1097_s13, 4  ;;  %s710_s19 = sshll.u32 %s428_s28, 4  ;;  %s711_s19 = int_to_ptr.vmem [resolvable:$true] %s710_s19 }
 0x36d   : > { %s709_s23 = scalar_lea.hbm %s1354_s9, %s928_s24  ;;  %s1374_s30 = sand.u32 1, %s1085_s10  }
 0x36e   : > { %s712_s4 = sshll.u32 %s709_s23, 4  ;;  %s698_s11 = scalar_lea.sflag [#allocation4], %s1374_s30  ;;  %s713_s4 = int_to_ptr.hbm [resolvable:$true] %s712_s4 }
 0x36f   : > { %s1029_s14 = sshra.s32 %s713_s4, 4  ;;  %s1035_s13 = scalar_lea.hbm %s1354_s9, 32  ;;  %s1030_s14 = int_to_ptr.hbm [resolvable:$true] %s1029_s14 }
 0x370   : > { %s1031_s15 = scalar_lea.hbm %s1030_s14, 16  ;;  %p1036_p6 = scmp.lt.s32.totalorder %s1030_s14, %s1354_s9 }
 0x371   : > { %p1032_p2 = scmp.ne.s32.totalorder %s1030_s14, %s1031_s15  ;;  %p1037_p7 = scmp.lt.s32.totalorder %s1035_s13, %s1031_s15 }
 0x373   : > { %p1033_p4 = pnand %p1032_p2, %p1213_p3  ;;  %p1038_p8 = por %p1037_p7, %p1036_p6 }
 0x375   : > { %p1034_p5 = pneg %p1033_p4 }
 0x377   : > { %p1039_p10 = pnand %p1038_p8, %p1034_p5 }
 0x379   : > { %1042 = shalt.err (!%p1039_p10)
}
 0x37a   : > { %s1112_s29 = smov 128   ;;  %s1113_s28 = smov 8  }
 0x37b   : > { %929 = dma.vmem_to_hbm [thread:$0]  (%p1213_p3), %s711_s19, 256, %s713_s4, %s698_s11, %s1112_s29, %s1112_s29, %s1113_s28  }
 0x37c PF: > { %s1375_s27 = sld [smem:[#allocation6_spill]]  ;;  %p935_p11 = scmp.ge.s32.totalorder %s1109_s16, 2 }
 0x37e   : > { %p932_p12 = pnand %p935_p11, %p1223_p9 }
 0x380   : > { %p933_p13 = pneg %p932_p12 }
 0x382   : > { %s727_s24 = sand.u32 1, %s1375_s27  }
 0x383   : > { %s728_s18 = scalar_lea.sflag [#allocation4], %s727_s24 }
 0x384   : > { %1076 = dma.done.wait (%p933_p13), %s728_s18, 256  }
 0x385   : > { %1078 = vsyncadd (%p933_p13), %s728_s18, 4294967040  ;;  %s22_s16 = sadd.s32 1, %s1109_s16   ;;  %s1377_s12 = sld [smem:[#allocation7_spill]] }
 0x386   : > { %p19_p0 = scmp.ge.s32.totalorder %s22_s16, 10   ;;  %s1378_s11 = sld [smem:[#allocation13_spill]] }
 0x387   : > { %s1379_s21 = sld [smem:[#allocation8_spill]]  ;;  %s1383_s30 = smov %s1085_s10 }
 0x388   : > { %s1380_s13 = sld [smem:[#allocation9_spill]] }
 0x389   : > { %s1381_s14 = sld [smem:[#allocation10_spill]]  ;;  %21 = sbr.rel (!%p19_p0) target bundleno = 7 (0x7), region = 120 }
 0x38a   : > { %s1382_s15 = sld [smem:[#allocation11_spill]] }
 0x38b   : > { %s1384_s10 = smov %s1377_s12 }
 0x38d   : > { %s1385_s12 = smov %s1379_s21 }
 0x38e   :  { %734 = vsyncpa [#allocation4], 1 }
 0x38f   :  { %736 = vsyncpa [#allocation4 + $0x1], 1 }

</bundles_post_ra>
